<compile_context>
chip_gen: v5e
topology: v5e:2x2
jax: 0.10.0
libtpu: 0.0.40
codegen_flags: <defaults>
</compile_context>

<pallas_src>
import functools

import jax
import jax.numpy as jnp
from jax.experimental import pallas as pl
from jax.experimental.pallas import tpu as pltpu


# --------------------------------------------------------------------------
# Kernels
# --------------------------------------------------------------------------
def _eimask_rows_kernel(x_ref, o_ref, *, num_channels, ne, tm):
    """x_ref: (TM, TS) tile of the flattened (N*C, S) activation.

    Row r of the flat view belongs to channel (r % C). Excitatory channels
    (chan < ne) keep their sign; inhibitory channels are negated. Pure VPU /
    scalar work, so it hides completely under the HBM-bound DMA.
    """
    x = x_ref[...]
    row0 = pl.program_id(0) * tm
    rows = row0 + jax.lax.broadcasted_iota(jnp.int32, x.shape, 0)
    chan = rows % num_channels
    o_ref[...] = jnp.where(chan < ne, x, -x)


def _eimask_lanes_kernel(x_ref, o_ref, *, ne, tc):
    """x_ref: (TM, TC) tile of a (N, C) activation; channel lives on lanes."""
    x = x_ref[...]
    chan0 = pl.program_id(1) * tc
    chan = chan0 + jax.lax.broadcasted_iota(jnp.int32, x.shape, 1)
    o_ref[...] = jnp.where(chan < ne, x, -x)


# --------------------------------------------------------------------------
# Wrapper
# --------------------------------------------------------------------------
def _pick_tile(dim, target, multiple):
    """Largest tile <= target that is either the full dim or a multiple of
    `multiple` (satisfies the (8,128) block constraint in both cases)."""
    if dim <= target:
        return int(dim)
    return (target // multiple) * multiple


_COMPILER_PARAMS = pltpu.CompilerParams(
    dimension_semantics=("parallel", "parallel"),
    vmem_limit_bytes=32 * 1024 * 1024,
)


def eimask_forward(x: jnp.ndarray, ni: int, ne: int) -> jnp.ndarray:
    """Apply the signed E/I mask: channels [0, ne) -> +1, [ne, ne+ni) -> -1."""
    C = int(x.shape[1])
    assert C == ni + ne, "channel dim must equal ne + ni"

    if x.ndim == 2:
        # Linear case: (N, C), channel on the lane axis.
        N = int(x.shape[0])
        tm = _pick_tile(N, 256, 8)
        tc = _pick_tile(C, 2048, 128)
        return pl.pallas_call(
            functools.partial(_eimask_lanes_kernel, ne=ne, tc=tc),
            out_shape=jax.ShapeDtypeStruct((N, C), x.dtype),
            grid=(pl.cdiv(N, tm), pl.cdiv(C, tc)),
            in_specs=[pl.BlockSpec((tm, tc), lambda i, j: (i, j))],
            out_specs=pl.BlockSpec((tm, tc), lambda i, j: (i, j)),
            compiler_params=_COMPILER_PARAMS,
        )(x)

    # Conv / generic case: flatten channel into rows, trailing dims into lanes.
    N = int(x.shape[0])
    S = 1
    for d in x.shape[2:]:
        S *= int(d)
    R = N * C
    x2 = x.reshape(R, S)

    tm = _pick_tile(R, 256, 8)      # sublane-dense even when C is small
    ts = _pick_tile(S, 2048, 128)   # lane-dense, <=2 MiB f32 per buffer

    out = pl.pallas_call(
        functools.partial(_eimask_rows_kernel, num_channels=C, ne=ne, tm=tm),
        out_shape=jax.ShapeDtypeStruct((R, S), x.dtype),
        grid=(pl.cdiv(R, tm), pl.cdiv(S, ts)),
        in_specs=[pl.BlockSpec((tm, ts), lambda i, j: (i, j))],
        out_specs=pl.BlockSpec((tm, ts), lambda i, j: (i, j)),
        compiler_params=_COMPILER_PARAMS,
    )(x2)
    return out.reshape(x.shape)


def make_ei_mask(ni: int, ne: int, dtype=jnp.float32) -> jnp.ndarray:
    """Reference-only buffer: +1 for ne excitatory, -1 for ni inhibitory."""
    return jnp.concatenate(
        [jnp.ones((ne,), dtype), -jnp.ones((ni,), dtype)], axis=0
    )


# --------------------------------------------------------------------------
# Demo / correctness check
# --------------------------------------------------------------------------
if __name__ == "__main__":
    key = jax.random.PRNGKey(0)
    k1, k2, k3 = jax.random.split(key, 3)

    # 1) conv-style NCHW input: batch=2, channels=4 (ne=2, ni=2), 16x16 spatial
    ne, ni = 2, 2
    C = ne + ni
    x_conv = jax.random.normal(k1, (2, C, 16, 16), dtype=jnp.float32)
    out_conv = jax.block_until_ready(eimask_forward(x_conv, ni=ni, ne=ne))
    ref_conv = x_conv * make_ei_mask(ni, ne).reshape(1, C, 1, 1)
    assert out_conv.shape == x_conv.shape and out_conv.dtype == x_conv.dtype
    assert jnp.array_equal(out_conv, ref_conv)

    # 2) linear-style (N, C) input
    x_lin = jax.random.normal(k2, (2, C), dtype=jnp.float32)
    out_lin = jax.block_until_ready(eimask_forward(x_lin, ni=ni, ne=ne))
    ref_lin = x_lin * make_ei_mask(ni, ne).reshape(1, C)
    assert jnp.array_equal(out_lin, ref_lin)

    # 3) slightly larger conv input to exercise multi-tile grid + padded
    #    (non-divisible) lane tile handling.
    ne2, ni2 = 5, 3
    C2 = ne2 + ni2
    x_big = jax.random.normal(k3, (4, C2, 48, 64), dtype=jnp.float32)
    out_big = jax.block_until_ready(eimask_forward(x_big, ni=ni2, ne=ne2))
    ref_big = x_big * make_ei_mask(ni2, ne2).reshape(1, C2, 1, 1)
    assert jnp.array_equal(out_big, ref_big)

    print("KERNEL_OK")
</pallas_src>

<mosaic_0001>
module attributes {stable_mosaic.version = 11 : i64} {
  func.func @_eimask_rows_kernel(%arg0: i32, %arg1: i32, %arg2: memref<8x256xf32, #tpu.memory_space<vmem>>, %arg3: memref<8x256xf32, #tpu.memory_space<vmem>>) attributes {dimension_semantics = [#tpu.dimension_semantics<parallel>, #tpu.dimension_semantics<parallel>], iteration_bounds = array<i64: 1, 1>, scalar_prefetch = 0 : i64, scratch_operands = 0 : i64, tpu.core_type = #tpu.core_type<tc>, window_params = [{transform_indices = @transform_0, window_bounds = array<i64: 8, 256>}, {transform_indices = @transform_1, window_bounds = array<i64: 8, 256>}]} {
    %c0 = arith.constant 0 : index
    %c0_0 = arith.constant 0 : index
    %0 = vector.load %arg2[%c0, %c0_0] : memref<8x256xf32, #tpu.memory_space<vmem>>, vector<8x256xf32>
    %c8_i32 = arith.constant 8 : i32
    %1 = arith.muli %arg0, %c8_i32 : i32
    %2 = tpu.iota {dimensions = array<i32: 0>} : vector<8x256xi32>
    %3 = vector.broadcast %1 : i32 to vector<8x256xi32>
    %4 = arith.addi %3, %2 : vector<8x256xi32>
    %c4_i32 = arith.constant 4 : i32
    %c0_i32 = arith.constant 0 : i32
    %5 = arith.cmpi eq, %c4_i32, %c0_i32 : i32
    %c1_i32 = arith.constant 1 : i32
    %6 = arith.select %5, %c1_i32, %c4_i32 : i32
    %7 = vector.broadcast %6 : i32 to vector<8x256xi32>
    %8 = arith.remsi %4, %7 : vector<8x256xi32>
    %c0_i32_1 = arith.constant 0 : i32
    %9 = vector.broadcast %c0_i32_1 : i32 to vector<8x256xi32>
    %10 = arith.cmpi ne, %8, %9 : vector<8x256xi32>
    %c0_i32_2 = arith.constant 0 : i32
    %11 = vector.broadcast %c0_i32_2 : i32 to vector<8x256xi32>
    %12 = arith.cmpi slt, %8, %11 : vector<8x256xi32>
    %c0_i32_3 = arith.constant 0 : i32
    %13 = arith.cmpi slt, %6, %c0_i32_3 : i32
    %14 = vector.broadcast %13 : i1 to vector<8x256xi1>
    %15 = vector.broadcast %14 : vector<8x256xi1> to vector<8x256xi1>
    %16 = arith.xori %12, %15 : vector<8x256xi1>
    %17 = arith.andi %16, %10 : vector<8x256xi1>
    %18 = vector.broadcast %6 : i32 to vector<8x256xi32>
    %19 = arith.addi %8, %18 : vector<8x256xi32>
    %20 = arith.select %17, %19, %8 : vector<8x256xi1>, vector<8x256xi32>
    %c2_i32 = arith.constant 2 : i32
    %21 = vector.broadcast %c2_i32 : i32 to vector<8x256xi32>
    %22 = arith.cmpi slt, %20, %21 : vector<8x256xi32>
    %cst = arith.constant 0.000000e+00 : f32
    %23 = vector.broadcast %cst : f32 to vector<8x256xf32>
    %24 = arith.subf %23, %0 : vector<8x256xf32>
    %25 = arith.select %22, %0, %24 : vector<8x256xi1>, vector<8x256xf32>
    %c0_4 = arith.constant 0 : index
    %c0_5 = arith.constant 0 : index
    %26 = vector.load %arg3[%c0_4, %c0_5] : memref<8x256xf32, #tpu.memory_space<vmem>>, vector<8x256xf32>
    tpu.vector_store %arg3[%c0_4, %c0_5], %25 {strides = array<i32>} : memref<8x256xf32, #tpu.memory_space<vmem>>, vector<8x256xf32>,
    return
  }
  func.func @transform_0(%arg0: i32, %arg1: i32) -> (i32, i32) {
    %c0_i32 = arith.constant 0 : i32
    return %arg0, %arg1 : i32, i32
  }
  func.func @transform_1(%arg0: i32, %arg1: i32) -> (i32, i32) {
    %c0_i32 = arith.constant 0 : i32
    return %arg0, %arg1 : i32, i32
  }
}

</mosaic_0001>

<bundles_post_ra>
// kernel: tpu_custom_call.1
= control target key start
LH: loop header
LB: loop body
LE: loop exit
PB: predicated region body
PF: predicated region fallthrough
CT: control target
= control target key end

     0   :  { %6 = vsyncpa [#allocation3], 0  ;;  %s138_s0 = inlined_call_operand.hbm [shape: f32[8,256], index: 0, kind: input, shape index: {}]   ;;  %s139_s1 = inlined_call_operand.hbm [shape: f32[8,256], index: 1, kind: output, shape index: {}]  }
   0x1   :  { %7 = vsyncpa [#allocation4], 0  ;;  %s13_s8 = sshll.u32 %s138_s0, 4  ;;  %s120_s9 = smov [#allocation2]   ;;  %s14_s8 = int_to_ptr.hbm [resolvable:$true] %s13_s8 }
   0x2   :  { %s15_s10 = sshll.u32 %s120_s9, 4  ;;  %s16_s10 = int_to_ptr.vmem [resolvable:$true] %s15_s10 }
   0x3   :  { %18 = dma.hbm_to_vmem [thread:$0]  %s14_s8, 256, %s16_s10, [#allocation3]  }
   0x4   :  { %116 = dma.done.wait [#allocation3], 256  }
   0x5   :  { %117 = vsyncadd [#allocation3], 4294967040  ;;  %v26_v0 = vlaneseq  ;;  %v23_v3 = vld [vmem:[#allocation2] sm:$0xff]  ;;  %v24_v4 = vld [vmem:[#allocation2 + $0x8] sm:$0xff]  ;;  %s121_s11 = smov [#allocation5]   ;;  %s56_s15 = sshll.u32 %s139_s1, 4  ;;  %s57_s15 = int_to_ptr.hbm [resolvable:$true] %s56_s15 }
   0x6   :  { %s54_s12 = sshll.u32 %s121_s11, 4  ;;  %v43_v5 = vsub.f32 0.0, %v23_v3  ;;  %v44_v6 = vsub.f32 0.0, %v24_v4  ;;  %s55_s12 = int_to_ptr.vmem [resolvable:$true] %s54_s12 }
   0x7   :  { %v27_v1 = vshrl.u32 %v26_v0, 7 }
   0x9   :  { %v34_v2 = vand.u32 3, %v27_v1 }
   0xb   :  { %vm42_vm0 = vcmp.lt.s32.totalorder %v34_v2, 2 }
   0xc   :  { %v45_v7 = vsel %vm42_vm0, %v23_v3, %v43_v5  ;;  %v46_v8 = vsel %vm42_vm0, %v24_v4, %v44_v6 }
   0xd   :  { %47 = vst [vmem:[#allocation5] sm:$0xff] %v45_v7 }
   0xe   :  { %48 = vst [vmem:[#allocation5 + $0x8] sm:$0xff] %v46_v8 }
   0xf   :  { %59 = dma.vmem_to_hbm [thread:$0]  %s55_s12, 256, %s57_s15, [#allocation4]  }
  0x10   :  { %118 = dma.done.wait [#allocation4], 256  }
  0x11   :  { %119 = vsyncadd [#allocation4], 4294967040 }
  0x12   :  { %64 = vsyncpa [#allocation3], 1 }
  0x13   :  { %65 = vsyncpa [#allocation4], 1 }

</bundles_post_ra>
